<compile_context>
chip_gen: v5e
topology: v5e:2x2
jax: 0.10.0
libtpu: 0.0.40
codegen_flags: <defaults>
</compile_context>

<pallas_src>
import functools

import jax
import jax.numpy as jnp
from jax.experimental import pallas as pl
from jax.experimental.pallas import tpu as pltpu


def _pick_tile(n, pref):
    """Largest point tile <= pref that divides n and keeps (8,128) alignment."""
    if n <= pref:
        return n
    t = (pref // 128) * 128
    while t >= 128:
        if n % t == 0:
            return t
        t -= 128
    # TODO(synk): pad N to a multiple of 128 (with masked distances) instead
    # of falling back to a single huge block for awkward N.
    return n


# --------------------------------------------------------------------------
# Kernel 1: -(pairwise squared distances + duplicate penalty), fully tiled.
# --------------------------------------------------------------------------
def _neg_dist_kernel(lhs_ref, rhs_ref, pen_ref, out_ref):
    # lhs_ref: (1, C+2, TM) rows [-2x ; |x|^2 ; 1]   (query tile)
    # rhs_ref: (1, C+2, TN) rows [ x  ;   1   ; |x|^2] (point tile)
    # pen_ref: (1, 1, TN)   duplicate-point penalty row
    # out_ref: (1, TM, TN)  -(D + penalty)
    d = jax.lax.dot_general(lhs_ref[0], rhs_ref[0],
                            (((0,), (0,)), ((), ())),
                            preferred_element_type=jnp.float32)
    out_ref[0] = -(d + pen_ref[0])


def neg_pairwise_dist(x, r=None, pen_row=None):
    """x: (B, C, N) f32 -> -(D + pen) : (B, N, N) f32."""
    B, C, N = x.shape
    x = x.astype(jnp.float32)
    if r is None:
        r = jnp.sum(x * x, axis=1, keepdims=True)            # (B, 1, N)
    if pen_row is None:
        pen_row = jnp.zeros((B, 1, N), jnp.float32)
    ones = jnp.ones_like(r)
    lhs = jnp.concatenate([-2.0 * x, r, ones], axis=1)        # (B, C+2, N)
    rhs = jnp.concatenate([x, ones, r], axis=1)               # (B, C+2, N)

    tm = _pick_tile(N, 256)
    tncol = _pick_tile(N, 1024)
    return pl.pallas_call(
        _neg_dist_kernel,
        out_shape=jax.ShapeDtypeStruct((B, N, N), jnp.float32),
        grid=(B, N // tm, N // tncol),
        in_specs=[pl.BlockSpec((1, C + 2, tm), lambda b, i, j: (b, 0, i)),
                  pl.BlockSpec((1, C + 2, tncol), lambda b, i, j: (b, 0, j)),
                  pl.BlockSpec((1, 1, tncol), lambda b, i, j: (b, 0, j))],
        out_specs=pl.BlockSpec((1, tm, tncol), lambda b, i, j: (b, i, j)),
        compiler_params=pltpu.CompilerParams(
            dimension_semantics=("parallel", "parallel", "parallel"),
            vmem_limit_bytes=32 * 1024 * 1024),
    )(lhs, rhs, pen_row)


# --------------------------------------------------------------------------
# Kernel 2: dense edge-MLP chain + max over k, k-batched MXU matmuls.
# --------------------------------------------------------------------------
def _dense_edge_conv_kernel(n, k, g, tn, cdt, x_ref, nbr_ref, *rest):
    """x_ref: (1, C, TN) f32;  nbr_ref: (1, k, Gp, TN) gathered x@W0d (cdt).
    rest = [layer weights..., out_ref, h_scratch]:
      layer 0 : wx0T (Gp, C) cdt, b0 (Gp, 1) f32
      layer i : whiT (Gp, i*Gp) cdt, wxiT (Gp, C) cdt, bi (Gp, 1) f32
    out_ref : (1, C + n*Gp, TN) f32, channel order [h_{n-1}, ..., h_0, x]
    h_scratch (VMEM f32): ((n-1)*Gp, k*TN), k neighbour slabs along lanes."""
    w_refs = rest[:-2]
    out_ref = rest[-2]
    h_ref = rest[-1]

    x_t = x_ref[0]                                       # (C, TN) exact passthrough
    x_c = x_t.astype(cdt)

    def emit(i, slabs):
        # running max over k while slabs are still live; only layers < n-1 go
        # to scratch (the last layer is never stored, its max goes straight out)
        m = slabs[0]
        for kk in range(1, k):
            m = jnp.maximum(m, slabs[kk])
        out_ref[0, (n - 1 - i) * g:(n - i) * g, :] = m
        if i < n - 1:
            for kk in range(k):
                h_ref[i * g:(i + 1) * g, kk * tn:(kk + 1) * tn] = slabs[kk]

    # ---- layer 0: relu(x.(W0c - W0d) + gather(x.W0d) + b0) ----
    px = jnp.dot(w_refs[0][...], x_c,
                 preferred_element_type=jnp.float32) + w_refs[1][...]   # (Gp, TN)
    slabs = [jnp.maximum(px + nbr_ref[0, kk, :, :].astype(jnp.float32), 0.0)
             for kk in range(k)]
    emit(0, slabs)

    # ---- layers 1 .. n-1 : single (Gp, i*Gp) @ (i*Gp, k*TN) matmul each ----
    wi = 2
    for i in range(1, n):
        whT = w_refs[wi][...]
        wxT = w_refs[wi + 1][...]
        b = w_refs[wi + 2][...]
        wi += 3
        px = jnp.dot(wxT, x_c, preferred_element_type=jnp.float32) + b  # (Gp, TN)
        hprev = h_ref[0:i * g, :].astype(cdt)                           # (i*Gp, k*TN)
        hfull = jnp.dot(whT, hprev, preferred_element_type=jnp.float32) # (Gp, k*TN)
        slabs = []
        for kk in range(k):
            v = hfull[:, kk * tn:(kk + 1) * tn] + px
            if i < n - 1:
                v = jnp.maximum(v, 0.0)
            slabs.append(v)
        emit(i, slabs)

    out_ref[0, n * g:, :] = x_t                          # max_k of broadcast x == x


def _prep_weights(params, C, G, Gp, n, cdt):
    """Torch weights -> kernel layout, growth padded to Gp (multiple of 8)."""
    pad = Gp - G

    def pad_cols(w):
        return jnp.pad(w, ((0, 0), (0, pad)))

    def pad_bias(b):
        return jnp.pad(b.reshape(1, G), ((0, 0), (0, pad))).reshape(Gp, 1)

    w0, b0 = params[0]
    w0c, w0d = w0[:C], w0[C:]
    flat = [jnp.transpose(pad_cols(w0c - w0d)).astype(cdt),        # (Gp, C)
            pad_bias(b0).astype(jnp.float32)]                      # (Gp, 1)
    for i in range(1, n):
        wi, bi = params[i]
        # torch input-channel order of layer i is [h_{i-1}, ..., h_0, x];
        # the scratch stores [h_0, ..., h_{i-1}] in Gp-padded blocks.
        blocks = []
        for j in range(i):
            blk = wi[(i - 1 - j) * G:(i - j) * G]                  # (G, G)
            blocks.append(jnp.pad(blk, ((0, pad), (0, 0))))        # (Gp, G)
        wh = pad_cols(jnp.concatenate(blocks, axis=0))             # (i*Gp, Gp)
        wx = pad_cols(wi[i * G:])                                  # (C, Gp)
        flat += [jnp.transpose(wh).astype(cdt),
                 jnp.transpose(wx).astype(cdt),
                 pad_bias(bi).astype(jnp.float32)]
    w0d_p = pad_cols(w0d)                                          # (C, Gp)
    return flat, w0d_p


# --------------------------------------------------------------------------
# Wrapper reproducing DenseEdgeConv.forward (idx=None path)
# --------------------------------------------------------------------------
def dense_edge_conv(x, params, n, k, compute_dtype=jnp.float32):
    """x: (B, C, N) f32.  params: list of n (w (C_in, G), b (1, G)) in torch
    input-channel order.  Returns (y (B, C + n*G, N), idx (B, N, k))."""
    B, C, N = x.shape
    G = params[0][0].shape[1]
    Gp = -(-G // 8) * 8                      # pad growth to a multiple of 8
    x = x.astype(jnp.float32)
    cdt = jnp.dtype(compute_dtype)
    hi = jax.lax.Precision.HIGHEST

    # ---------------- group_knn(k+1, x, x, unique=True) ----------------
    r = jnp.sum(x * x, axis=1, keepdims=True)                  # (B, 1, N)

    # Duplicate-point mask (np.unique equivalent): exact row equality built
    # with a per-channel loop so no (B, N, N, C) tensor is materialised.
    # TODO(synk): fuse this mask (and ideally an iterative k-min) into the
    # distance kernel to shrink HBM traffic from O(N^2) to O(N*k).
    eq = jnp.ones((B, N, N), dtype=bool)
    for c in range(C):
        xc = x[:, c, :]
        eq = eq & (xc[:, :, None] == xc[:, None, :])
    lower = jnp.tril(jnp.ones((N, N), dtype=bool), k=-1)
    dup = jnp.any(eq & lower[None], axis=-1)                   # (B, N)
    # Upper bound on max(D): |p_i - p_j|^2 <= 4*max|p|^2.  Selection-equivalent
    # to torch's max(D) scaling (the forward only consumes idx, not distances).
    penalty = 4.0 * jnp.max(r)
    pen_row = (penalty * dup.astype(jnp.float32))[:, None, :]  # (B, 1, N)

    neg_d = neg_pairwise_dist(x, r, pen_row)                   # (B, N, N)
    # TODO(synk): top_k stays in JAX; fusing a (k+1)-min into the distance
    # kernel would avoid writing/reading the full NxN matrix.
    _, idx_full = jax.lax.top_k(neg_d, k + 1)                  # (B, N, k+1)
    idx = idx_full[:, :, 1:]                                   # drop self

    # ------------- weight preprocessing (algebraic split + padding) -------------
    flat_w, w0d_p = _prep_weights(params, C, G, Gp, n, cdt)

    # Layer-0 neighbour projection, gathered DIRECTLY into (B, k, Gp, N)
    # (no HBM transpose of the gathered tensor).
    # TODO(synk): for G > C gather raw neighbour points and project in-kernel.
    p0 = jnp.einsum('bcn,cg->bgn', x, w0d_p, precision=hi).astype(cdt)  # (B, Gp, N)
    idxT = jnp.transpose(idx, (0, 2, 1))                                # (B, k, N)
    gather_one = lambda p, ii: p[:, ii]                                 # (Gp,N),(N,)->(Gp,N)
    nbr0 = jax.vmap(jax.vmap(gather_one, in_axes=(None, 0)),
                    in_axes=(0, 0))(p0, idxT)                           # (B, k, Gp, N)

    # ---------------- dense MLP chain + max over k (Pallas) ----------------
    c_tot = C + n * Gp
    tn = _pick_tile(N, 512)
    w_specs = [pl.BlockSpec(w.shape, lambda b, t: (0, 0)) for w in flat_w]

    y_pad = pl.pallas_call(
        functools.partial(_dense_edge_conv_kernel, n, k, Gp, tn, cdt),
        out_shape=jax.ShapeDtypeStruct((B, c_tot, N), jnp.float32),
        grid=(B, N // tn),
        in_specs=[pl.BlockSpec((1, C, tn), lambda b, t: (b, 0, t)),
                  pl.BlockSpec((1, k, Gp, tn), lambda b, t: (b, 0, 0, t))]
                 + w_specs,
        out_specs=pl.BlockSpec((1, c_tot, tn), lambda b, t: (b, 0, t)),
        scratch_shapes=[pltpu.VMEM((max(n - 1, 1) * Gp, k * tn), jnp.float32)],
        compiler_params=pltpu.CompilerParams(
            dimension_semantics=("parallel", "parallel"),
            vmem_limit_bytes=48 * 1024 * 1024),
    )(x, nbr0, *flat_w)

    if Gp != G:   # strip the growth padding channels
        parts = [y_pad[:, p * Gp:p * Gp + G, :] for p in range(n)]
        parts.append(y_pad[:, n * Gp:, :])
        y = jnp.concatenate(parts, axis=1)
    else:
        y = y_pad
    return y, idx                                               # (B, C', N), (B, N, k)


# --------------------------------------------------------------------------
# Pure-JAX reference (torch transcription; reuses the Pallas idx to avoid
# top_k tie divergence) -- self-test only.
# --------------------------------------------------------------------------
def _reference(x, params, n, idx):
    hi = jax.lax.Precision.HIGHEST
    pts = jnp.transpose(x, (0, 2, 1))                           # (B, N, C)
    knn = jax.vmap(lambda p, i: p[i])(pts, idx)                 # (B, N, k, C)
    center = jnp.broadcast_to(pts[:, :, None, :], knn.shape)
    y = jnp.concatenate([center, knn - center], axis=-1)
    xk = center
    for i, (w, b) in enumerate(params):
        h = jnp.einsum("bnkc,cg->bnkg", y, w, precision=hi) + b
        if i == 0:
            y = jnp.concatenate([jnp.maximum(h, 0.0), xk], axis=-1)
        elif i == n - 1:
            y = jnp.concatenate([h, y], axis=-1)
        else:
            y = jnp.concatenate([jnp.maximum(h, 0.0), y], axis=-1)
    return jnp.transpose(jnp.max(y, axis=2), (0, 2, 1))         # (B, C', N)


def _make_params(key, C, growth, n):
    keys = jax.random.split(key, 2 * n)
    params = []
    chan = C
    for i in range(n):
        if i == 0:
            cin = 2 * C
        else:
            chan += growth
            cin = chan
        w = 0.1 * jax.random.normal(keys[2 * i], (cin, growth), dtype=jnp.float32)
        b = 0.1 * jax.random.normal(keys[2 * i + 1], (1, growth), dtype=jnp.float32)
        params.append((w, b))
    return params


if __name__ == "__main__":
    # ---- config 1: DenseEdgeConv(in_channels=8, growth_rate=8, n=3, k=4) ----
    B, C, N = 2, 8, 16
    growth, n, k = 8, 3, 4

    key = jax.random.PRNGKey(0)
    kx, kp, kx2, kp2 = jax.random.split(key, 4)
    x = jax.random.normal(kx, (B, C, N), dtype=jnp.float32)
    x = x.at[:, :, 3].set(x[:, :, 1])          # duplicated point (unique=True path)
    params = _make_params(kp, C, growth, n)

    # --- pairwise-distance kernel self-check (no penalty) ---
    neg_d = jax.block_until_ready(neg_pairwise_dist(x))
    pts = jnp.transpose(x, (0, 2, 1))
    rr = jnp.sum(pts * pts, axis=2, keepdims=True)
    mm = jnp.einsum('bnc,bmc->bnm', pts, pts, precision=jax.lax.Precision.HIGHEST)
    d_ref = rr - 2.0 * mm + jnp.transpose(rr, (0, 2, 1))
    assert jnp.allclose(-neg_d, d_ref, rtol=1e-4, atol=1e-3), "distance mismatch"

    # --- full forward, f32 MXU operands (tight check) ---
    fwd32 = jax.jit(functools.partial(dense_edge_conv, n=n, k=k,
                                      compute_dtype=jnp.float32))
    y, idx = fwd32(x, params)
    y = jax.block_until_ready(y)
    idx = jax.block_until_ready(idx)
    assert y.shape == (B, C + n * growth, N)
    assert idx.shape == (B, N, k)
    y_ref = _reference(x, params, n, idx)
    assert jnp.allclose(y, y_ref, rtol=1e-4, atol=1e-4), "f32 mismatch vs reference"

    # --- full forward, bf16 MXU operands / f32 accumulation (loose check) ---
    fwd16 = jax.jit(functools.partial(dense_edge_conv, n=n, k=k,
                                      compute_dtype=jnp.bfloat16))
    y16, idx16 = fwd16(x, params)
    y16 = jax.block_until_ready(y16)
    y16_ref = _reference(x, params, n, idx16)
    assert jnp.allclose(y16, y16_ref, rtol=2e-2, atol=2e-2), "bf16 mismatch vs reference"

    # ---- config 2: growth not a multiple of 8 exercises the G-padding path ----
    C2, growth2, n2, k2 = 5, 6, 2, 3
    x2 = jax.random.normal(kx2, (B, C2, N), dtype=jnp.float32)
    params2 = _make_params(kp2, C2, growth2, n2)
    fwd2 = jax.jit(functools.partial(dense_edge_conv, n=n2, k=k2,
                                     compute_dtype=jnp.float32))
    y2, idx2 = fwd2(x2, params2)
    y2 = jax.block_until_ready(y2)
    assert y2.shape == (B, C2 + n2 * growth2, N)
    y2_ref = _reference(x2, params2, n2, idx2)
    assert jnp.allclose(y2, y2_ref, rtol=1e-4, atol=1e-4), "padded-G mismatch"

    print("KERNEL_OK")
</pallas_src>

<mosaic_0001>
module attributes {stable_mosaic.version = 11 : i64} {
  func.func @_neg_dist_kernel(%arg0: i32, %arg1: i32, %arg2: i32, %arg3: memref<1x10x16xf32, #tpu.memory_space<vmem>>, %arg4: memref<1x10x16xf32, #tpu.memory_space<vmem>>, %arg5: memref<1x1x16xf32, #tpu.memory_space<vmem>>, %arg6: memref<1x16x16xf32, #tpu.memory_space<vmem>>) attributes {dimension_semantics = [#tpu.dimension_semantics<parallel>, #tpu.dimension_semantics<parallel>, #tpu.dimension_semantics<parallel>], iteration_bounds = array<i64: 2, 1, 1>, scalar_prefetch = 0 : i64, scratch_operands = 0 : i64, tpu.core_type = #tpu.core_type<tc>, window_params = [{transform_indices = @transform_0, window_bounds = array<i64: 1, 10, 16>}, {transform_indices = @transform_1, window_bounds = array<i64: 1, 10, 16>}, {transform_indices = @transform_2, window_bounds = array<i64: 1, 1, 16>}, {transform_indices = @transform_3, window_bounds = array<i64: 1, 16, 16>}]} {
    %c0 = arith.constant 0 : index
    %c0_0 = arith.constant 0 : index
    %c0_1 = arith.constant 0 : index
    %0 = vector.load %arg3[%c0, %c0_0, %c0_1] : memref<1x10x16xf32, #tpu.memory_space<vmem>>, vector<1x10x16xf32>
    %1 = vector.shape_cast %0 : vector<1x10x16xf32> to vector<10x16xf32>
    %c0_2 = arith.constant 0 : index
    %c0_3 = arith.constant 0 : index
    %c0_4 = arith.constant 0 : index
    %2 = vector.load %arg4[%c0_2, %c0_3, %c0_4] : memref<1x10x16xf32, #tpu.memory_space<vmem>>, vector<1x10x16xf32>
    %3 = vector.shape_cast %2 : vector<1x10x16xf32> to vector<10x16xf32>
    %cst = arith.constant dense<0.000000e+00> : vector<16x16xf32>
    %4 = tpu.matmul %1, %3, %cst {dimension_numbers = #tpu.dot_dimension_numbers<[0], [0], [1], [1], [0, 1, 1, 1], [], []>} : vector<10x16xf32>, vector<10x16xf32>, vector<16x16xf32> -> vector<16x16xf32>
    %c0_5 = arith.constant 0 : index
    %c0_6 = arith.constant 0 : index
    %c0_7 = arith.constant 0 : index
    %5 = vector.load %arg5[%c0_5, %c0_6, %c0_7] : memref<1x1x16xf32, #tpu.memory_space<vmem>>, vector<1x1x16xf32>
    %6 = vector.shape_cast %5 : vector<1x1x16xf32> to vector<1x16xf32>
    %7 = vector.broadcast %6 : vector<1x16xf32> to vector<16x16xf32>
    %8 = arith.addf %4, %7 : vector<16x16xf32>
    %cst_8 = arith.constant 0.000000e+00 : f32
    %9 = vector.broadcast %cst_8 : f32 to vector<16x16xf32>
    %10 = arith.subf %9, %8 : vector<16x16xf32>
    %c0_9 = arith.constant 0 : index
    %c0_10 = arith.constant 0 : index
    %c0_11 = arith.constant 0 : index
    %11 = vector.load %arg6[%c0_9, %c0_10, %c0_11] : memref<1x16x16xf32, #tpu.memory_space<vmem>>, vector<1x16x16xf32>
    %12 = vector.shape_cast %11 : vector<1x16x16xf32> to vector<16x16xf32>
    %13 = vector.shape_cast %10 : vector<16x16xf32> to vector<1x16x16xf32>
    tpu.vector_store %arg6[%c0_9, %c0_10, %c0_11], %13 {strides = array<i32>} : memref<1x16x16xf32, #tpu.memory_space<vmem>>, vector<1x16x16xf32>,
    return
  }
  func.func @transform_0(%arg0: i32, %arg1: i32, %arg2: i32) -> (i32, i32, i32) {
    %c0_i32 = arith.constant 0 : i32
    %c0_i32_0 = arith.constant 0 : i32
    return %arg0, %c0_i32, %arg1 : i32, i32, i32
  }
  func.func @transform_1(%arg0: i32, %arg1: i32, %arg2: i32) -> (i32, i32, i32) {
    %c0_i32 = arith.constant 0 : i32
    %c0_i32_0 = arith.constant 0 : i32
    return %arg0, %c0_i32, %arg2 : i32, i32, i32
  }
  func.func @transform_2(%arg0: i32, %arg1: i32, %arg2: i32) -> (i32, i32, i32) {
    %c0_i32 = arith.constant 0 : i32
    %c0_i32_0 = arith.constant 0 : i32
    return %arg0, %c0_i32, %arg2 : i32, i32, i32
  }
  func.func @transform_3(%arg0: i32, %arg1: i32, %arg2: i32) -> (i32, i32, i32) {
    %c0_i32 = arith.constant 0 : i32
    return %arg0, %arg1, %arg2 : i32, i32, i32
  }
}

</mosaic_0001>

<bundles_post_ra>
// kernel: tpu_custom_call.1
= control target key start
LH: loop header
LB: loop body
LE: loop exit
PB: predicated region body
PF: predicated region fallthrough
CT: control target
= control target key end

     0   :  { %8 = vsyncpa [#allocation3], 0  ;;  %s758_s0 = inlined_call_operand.vmem [shape: f32[2,10,16], index: 0, kind: input, shape index: {}]   ;;  %s759_s1 = inlined_call_operand.vmem [shape: f32[2,10,16], index: 1, kind: input, shape index: {}]   ;;  %s760_s2 = inlined_call_operand.vmem [shape: f32[2,1,16], index: 2, kind: input, shape index: {}]   ;;  %s761_s3 = inlined_call_operand.hbm [shape: f32[2,16,16], index: 3, kind: output, shape index: {}]  }
   0x1   :  { %10 = vsyncpa [#allocation3 + $0x1], 0  ;;  %s655_s12 = smov 0   ;;  %s657_s13 = smov 0  }
   0x2   :  { %s659_s14 = smov 0   ;;  %s661_s15 = smov 0  }
   0x3   :  { %s663_s16 = smov 0   ;;  %s665_s17 = smov 0  }
   0x4 LB: > { %s471_s18 = sadd.s32 4294967295, %s631_s17   ;;  %s472_s19 = sadd.s32 4294967294, %s631_s17   ;;  %s631_s17 = sphi %s665_s17, %s16_s17   ;;  %s627_s16 = sphi %s663_s16, %s768_s16   ;;  %s623_s15 = sphi %s661_s15, %s767_s15   ;;  %s619_s14 = sphi %s659_s14, %s766_s14   ;;  %s615_s13 = sphi %s657_s13, %s765_s13   ;;  %s611_s12 = sphi %s655_s12, %s764_s12  }
   0x5   : > { %s35_s20 = sadd.s32 1, %s627_s16  ;;  %s130_s21 = sadd.s32 1, %s619_s14 }
   0x6   : > { %p37_p0 = scmp.ge.s32.totalorder %s35_s20, 2  ;;  %p140_p1 = scmp.ne.s32.totalorder %s619_s14, %s615_s13 }
   0x7   : > { %p141_p2 = scmp.eq.s32.totalorder %s471_s18, 1  ;;  %p146_p3 = scmp.ne.s32.totalorder %s615_s13, %s611_s12 }
   0x8   : > { %s770_s20 = smov (%p37_p0, %s35_s20), 0  ;;  %p147_p5 = scmp.eq.s32.totalorder %s472_s19, 1 }
   0x9   : > { %p695_p4 = por %p141_p2, %p140_p1  ;;  %s123_s23 = ssub.s32 %s627_s16, %s770_s20 }
   0xa   : > { %p475_p6 = scmp.ge.s32.totalorder %s631_s17, 1  ;;  %p128_p7 = scmp.eq.s32.totalorder %s123_s23, 0 }
   0xb   : > { %p702_p8 = por %p147_p5, %p146_p3  ;;  %p196_p9 = scmp.lt.s32.totalorder %s631_s17, 3 }
   0xc   : > { %s708_s25 = scalar_select %p128_p7, %s619_s14, %s130_s21  }
   0xd   : > { %p197_p10 = pnand %p475_p6, %p196_p9 }
   0xe   : > { %p237_p11 = scmp.lt.s32.totalorder (!%p197_p10), %s623_s15, 1  ;;  %s234_s10 = sand.u32 (!%p197_p10), 1, %s615_s13  }
   0xf   : > { %200 = sbr.rel (%p197_p10) target bundleno = 332 (0x14c), region = 32  ;;  %s476_s11 = sshll.u32 (!%p197_p10), %s234_s10, 4 }
  0x10   : > { %s491_s18 = sshll.u32 (!%p197_p10), %s623_s15, 4  ;;  %s340_s29 = scalar_lea.sflag (!%p197_p10), [#allocation3], %s234_s10 }
  0x11   : > { %s354_s23 = scalar_lea.hbm (!%p197_p10), %s761_s3, %s491_s18 }
  0x12   : > { %s357_s28 = sshll.u32 (!%p197_p10), %s354_s23, 4  ;;  %s358_s28 = int_to_ptr.hbm [resolvable:$true] %s357_s28 }
  0x14   : > { %s238_s26 = scalar_select %p237_p11, %s623_s15, 1  ;;  %vm307_vm0 = vcmask 1041408   ;;  %vm300_vm1 = vcmask 80896   ;;  %vm336_vm2 = vcmask 130048  }
  0x16   : > { %s489_s27 = sshll.u32 %s238_s26, 4  ;;  %s258_s9 = scalar_lea.vmem %s760_s2, %s238_s26 }
  0x17   : > { %s244_s30 = scalar_lea.vmem %s758_s0, %s489_s27  ;;  %s252_s6 = scalar_lea.vmem %s759_s1, %s489_s27  ;;  %v552_v6 = vld [vmem:[%s258_s9] ss:$0 sm:$0xff] }
  0x18   : > { %v260_v0 = vld [vmem:[%s244_s30] sm:$0xff]  ;;  %v263_v1 = vld [vmem:[%s252_s6 + $0x8] sm:$0x3]  ;;  %s236_s27 = scalar_lea.vmem [#allocation2], %s476_s11 }
  0x19   : > { %268 = vxpose.xlu0.b32.start [1/2] (short) (narrow) %v260_v0, 16  ;;  %481 = vmatpush.msk.msra.mxu0 %vm307_vm0, %v263_v1  ;;  %v262_v2 = vld [vmem:[%s252_s6] sm:$0xff]  ;;  %v261_v3 = vld [vmem:[%s244_s30 + $0x8] sm:$0x3]  ;;  %s355_s26 = sshll.u32 %s236_s27, 4  ;;  %s567_s30 = sshra.s32 %s358_s28, 4  ;;  %s356_s26 = int_to_ptr.vmem [resolvable:$true] %s355_s26  ;;  %s568_s30 = int_to_ptr.hbm [resolvable:$true] %s567_s30 }
  0x1a   : > { %492 = vmatpush.msk.msra.mxu1 %vm307_vm0, %v263_v1  ;;  %s569_s15 = scalar_lea.hbm %s568_s30, 16  ;;  %s573_s6 = scalar_lea.hbm %s761_s3, 32 }
  0x1b   : > { %326 = vmatpush.msra.mxu0 %v262_v2  ;;  %p570_p12 = scmp.ne.s32.totalorder %s568_s30, %s569_s15  ;;  %p574_p1 = scmp.lt.s32.totalorder %s568_s30, %s761_s3 }
  0x1c   : > { %493 = vmatpush.msra.mxu1 %v262_v2  ;;  %p575_p2 = scmp.lt.s32.totalorder %s573_s6, %s569_s15 }
  0x1d   : > { %p571_p13 = pnand %p570_p12, %p695_p4 }
  0x1e   : > { %p576_p3 = por %p575_p2, %p574_p1 }
  0x1f   : > { %p572_p0 = pneg %p571_p13 }
  0x21   : > { %269 = vxpose.xlu0.b32.end [2/2] (short) (narrow) %v261_v3, 16  ;;  %p577_p5 = pnand %p576_p3, %p572_p0 }
  0xbd   : > { %v284_v4 = vpop.trf.xlu0 }
  0xbe   : > { %482 = vmatmul.msk.f32.vlgmr.msra.gmra.mxu0 %vm300_vm1, %v284_v4 }
  0xc5   : > { %v285_v5 = vpop.trf.xlu0 }
  0xc6   : > { %483 = vmatmul.msk.f32.vlgmr.msra.gmra.mxu1 %vm300_vm1, %v285_v5 }
 0x13b   : > { %v328_v7 = vpop.f32.mrf.mxu0 }
 0x13c   : > { %v329_v8 = vadd.f32 %v552_v6, %v328_v7 }
 0x13e   : > { %v334_v9 = vsub.f32 0.0, %v329_v8 }
 0x140   : > { %337 = vst.msk [vmem:[%s236_s27] sm:$0xff] %vm336_vm2, %v334_v9 }
 0x143   : > { %v331_v10 = vpop.f32.mrf.mxu1 }
 0x144   : > { %v332_v11 = vadd.f32 %v552_v6, %v331_v10 }
 0x146   : > { %v335_v12 = vsub.f32 0.0, %v332_v11 }
 0x148   : > { %338 = vst.msk [vmem:[%s236_s27 + $0x8] sm:$0xff] %vm336_vm2, %v335_v12 }
 0x149   : > { %580 = shalt.err (!%p577_p5)
}
 0x14a   : > { %s633_s9 = smov 128   ;;  %s634_s10 = smov 8  }
 0x14b   : > { %494 = dma.vmem_to_hbm [thread:$0]  (%p695_p4), %s356_s26, 256, %s358_s28, %s340_s29, %s633_s9, %s633_s9, %s634_s10  }
 0x14c PF: > { %p500_p6 = scmp.ge.s32.totalorder %s631_s17, 2  ;;  %s372_s11 = sand.u32 1, %s611_s12  }
 0x14d   : > { %s373_s18 = scalar_lea.sflag [#allocation3], %s372_s11 }
 0x14e   : > { %p497_p7 = pnand %p500_p6, %p702_p8 }
 0x150   : > { %p498_p9 = pneg %p497_p7 }
 0x152   : > { %606 = dma.done.wait (%p498_p9), %s373_s18, 256  }
 0x153   : > { %608 = vsyncadd (%p498_p9), %s373_s18, 4294967040  ;;  %s16_s17 = sadd.s32 1, %s631_s17   ;;  %s764_s12 = smov %s615_s13 }
 0x154   : > { %p13_p10 = scmp.ge.s32.totalorder %s16_s17, 4   ;;  %s765_s13 = smov %s619_s14 }
 0x155   : > { %s766_s14 = smov %s708_s25  ;;  %s767_s15 = smov %s627_s16 }
 0x156   : > { %s768_s16 = smov %s770_s20  ;;  %15 = sbr.rel (!%p13_p10) target bundleno = 4 (0x4), region = 73 }
 0x15b   :  { %379 = vsyncpa [#allocation3], 1 }
 0x15c   :  { %381 = vsyncpa [#allocation3 + $0x1], 1 }

</bundles_post_ra>
